<compile_context>
chip_gen: v6e
topology: v6e:2x2x1
jax: 0.10.0
libtpu: 0.0.40
codegen_flags: <defaults>
</compile_context>

<pallas_src>
import jax
import jax.numpy as jnp
from jax import lax
from jax.experimental import pallas as pl
from jax.experimental.pallas import tpu as pltpu

EPS = 1e-5
LANE = 128
SUBLANE = 8
TAP_MIN_CIN = 128   # below this, use the im2col path (deeper MXU K = 9*cin)


def _round_up(x, m):
    return (x + m - 1) // m * m


def _tpu_caps():
    kind = ""
    try:
        kind = jax.devices()[0].device_kind.lower()
    except Exception:
        pass
    cap = None
    try:
        cap = int(pltpu.get_tpu_info().vmem_capacity_bytes)
    except Exception:
        cap = None
    if cap is None:
        cap = (64 << 20) if "v7" in kind else (128 << 20)
    pre_v6 = any(t in kind for t in ("v2", "v3", "v4", "v5"))
    return cap, pre_v6


_VMEM_CAP_BYTES, _PRE_V6 = _tpu_caps()


def _vmem_limit(*block_bytes):
    need = 2 * sum(block_bytes) + (8 << 20)
    cap = (_VMEM_CAP_BYTES * 3) // 4      # headroom: 48 MiB v7x, 96 MiB v5e/v6e
    return int(min(max(need, 32 << 20), cap))


def _pick_tco(cout_p):
    # v5e MXU is 128x128: N=256 only adds store/VMEM pressure there.
    if (not _PRE_V6) and cout_p % 256 == 0:
        return 256
    return LANE


# ---------------------------------------------------------------------------
# Canonical "flat padded slab" activation layout for the stride-1 tap convs.
#
#   rows [0, TM)          : zeros               (lead block, == one M tile)
#   rows [TM, TM+R)       : (iy, ix) over the (h+2, wp) padded spatial grid,
#                           interior = activation, 1-px halo + width pad = 0
#   rows [TM+R, MI)       : zeros               (tail block + read overrun)
#
# A stride-1 3x3 conv maps output slab row r to input slab rows
# r + (ky-1)*wp + (kx-1), so conv1's output slab is consumed by conv2 with no
# XLA glue in between.
# ---------------------------------------------------------------------------
def _slab_geom(h, w):
    wp = _round_up(w + 2, SUBLANE)
    hp = h + 2
    tm = max(256, _round_up(wp + 1, SUBLANE))   # lead block must cover wp+1 rows
    r = hp * wp
    rp = _round_up(r, tm)
    mi = tm + rp + tm
    return wp, hp, tm, r, rp, mi


def slab_from_nhwc(x_nhwc, c_p, dtype=jnp.bfloat16):
    n, h, w, c = x_nhwc.shape
    wp, hp, tm, r, rp, mi = _slab_geom(h, w)
    xp = jnp.pad(x_nhwc, ((0, 0), (1, 1), (1, wp - w - 1), (0, c_p - c)))
    xf = xp.reshape(n, r, c_p)
    xf = jnp.pad(xf, ((0, 0), (tm, mi - tm - r), (0, 0)))
    return xf.astype(dtype)


def nhwc_from_slab(slab, h, w, c):
    n = slab.shape[0]
    wp, hp, tm, r, rp, mi = _slab_geom(h, w)
    core = slab[:, tm:tm + r, :].reshape(n, hp, wp, slab.shape[-1])
    return core[:, 1:1 + h, 1:1 + w, :c]


def _slab_valid_mask(h, w):
    wp, hp, tm, r, rp, mi = _slab_geom(h, w)
    row = jnp.arange(mi, dtype=jnp.int32)
    q = row - tm
    oy = q // wp
    ox = q - oy * wp
    valid = (q >= 0) & (q < r) & (oy >= 1) & (oy <= h) & (ox >= 1) & (ox <= w)
    return valid.astype(jnp.float32)[:, None]            # (MI, 1)


# ---------------------------------------------------------------------------
# Kernel 1: stride-1 3x3 conv (+folded BN) (+residual) + ReLU on slab layout,
# computed as 9 shifted-tap matmuls with an M (output-row) grid axis.
# ---------------------------------------------------------------------------
def _make_tap_kernel(offs, tm, with_res):
    def kernel(*refs):
        if with_res:
            x_ref, w_ref, b_ref, mask_ref, r_ref, o_ref = refs
        else:
            x_ref, w_ref, b_ref, mask_ref, o_ref = refs
            r_ref = None
        m = pl.program_id(2)
        is_core = jnp.logical_and(m >= 1, m < pl.num_programs(2) - 1)

        @pl.when(jnp.logical_not(is_core))
        def _pad_block():                   # lead / tail blocks: exact zeros
            o_ref[...] = jnp.zeros_like(o_ref)

        @pl.when(is_core)
        def _core_block():
            nco = o_ref.shape[-1]
            base = pl.multiple_of(m * tm, tm)       # first output-slab row
            acc = jnp.zeros((tm, nco), jnp.float32)
            for t, off in enumerate(offs):          # 9 taps, Ref offset loads
                xt = x_ref[pl.ds(base + off, tm), :]
                acc = acc + jnp.dot(xt, w_ref[t],
                                    preferred_element_type=jnp.float32)
            y = acc + b_ref[...]
            if with_res:
                y = y + r_ref[...].astype(jnp.float32)   # VPU add, no matmul
            # halo / padded rows -> exact zeros (next layer reads them as pad)
            y = jnp.maximum(y, 0.0) * mask_ref[...]
            o_ref[...] = y.astype(o_ref.dtype)
    return kernel


def conv3x3_s1_slab(x_slab, w_hwio, scale, bias, h, w,
                    residual_slab=None, out_dtype=jnp.bfloat16):
    """3x3 / stride-1 conv + folded BN (+residual) + ReLU; slab in / slab out."""
    n, mi, cin_p = x_slab.shape
    cin, cout = w_hwio.shape[2], w_hwio.shape[3]
    cout_p = _round_up(cout, LANE)
    wp, hp, tm, r, rp, mi_g = _slab_geom(h, w)
    assert mi == mi_g, (mi, mi_g)

    offs = tuple((ky - 1) * wp + (kx - 1) for ky in range(3) for kx in range(3))

    wf = w_hwio * scale.reshape(1, 1, 1, -1)               # fold BN scale
    wf = jnp.pad(wf, ((0, 0), (0, 0), (0, cin_p - cin), (0, cout_p - cout)))
    wf = wf.reshape(9, cin_p, cout_p).astype(jnp.bfloat16)
    bf = jnp.pad(bias, (0, cout_p - cout)).reshape(1, cout_p).astype(jnp.float32)
    mask = _slab_valid_mask(h, w)

    tco = _pick_tco(cout_p)
    grid = (n, cout_p // tco, mi // tm)

    in_specs = [
        pl.BlockSpec((None, mi, cin_p), lambda b, j, m: (b, 0, 0)),   # whole slab
        pl.BlockSpec((9, cin_p, tco), lambda b, j, m: (0, 0, j)),
        pl.BlockSpec((1, tco), lambda b, j, m: (0, j)),
        pl.BlockSpec((tm, 1), lambda b, j, m: (m, 0)),
    ]
    args = [x_slab, wf, bf, mask]
    res_bytes = 0
    if residual_slab is not None:
        assert residual_slab.shape == (n, mi, cout_p), residual_slab.shape
        in_specs.append(pl.BlockSpec((None, tm, tco), lambda b, j, m: (b, m, j)))
        args.append(residual_slab)
        res_bytes = tm * tco * 2

    out_bytes = 2 if out_dtype == jnp.bfloat16 else 4
    flops = 2 * n * rp * 9 * cin_p * cout_p
    bytes_accessed = int(n * mi * cin_p * 2 + wf.size * 2
                         + n * mi * cout_p * out_bytes
                         + (n * mi * cout_p * 2 if residual_slab is not None else 0))

    return pl.pallas_call(
        _make_tap_kernel(offs, tm, residual_slab is not None),
        out_shape=jax.ShapeDtypeStruct((n, mi, cout_p), out_dtype),
        grid=grid,
        in_specs=in_specs,
        out_specs=pl.BlockSpec((None, tm, tco), lambda b, j, m: (b, m, j)),
        compiler_params=pltpu.CompilerParams(
            dimension_semantics=("parallel", "parallel", "parallel"),
            vmem_limit_bytes=_vmem_limit(mi * cin_p * 2, 9 * cin_p * tco * 2,
                                         tm * tco * (4 + out_bytes),
                                         res_bytes, tm * 4)),
        cost_estimate=pl.CostEstimate(flops=flops, transcendentals=0,
                                      bytes_accessed=bytes_accessed),
    )(*args)


# ---------------------------------------------------------------------------
# Kernel 2: patch matmul + folded BN (+residual) (+ReLU).  Used for strided
# convs, the 1x1 shortcut, and stride-1 convs with small cin (deep K = 9*cin).
# ---------------------------------------------------------------------------
def _make_mm_kernel(relu, with_res, multi_k):
    def kernel(*refs):
        if multi_k:
            *in_refs, o_ref, acc_ref = refs
        else:
            *in_refs, o_ref = refs
            acc_ref = None
        if with_res:
            p_ref, w_ref, b_ref, r_ref = in_refs
        else:
            p_ref, w_ref, b_ref = in_refs
            r_ref = None

        def epilogue(acc):
            y = acc + b_ref[...]
            if with_res:
                y = y + r_ref[...].astype(jnp.float32)
            if relu:
                y = jnp.maximum(y, 0.0)
            o_ref[...] = y.astype(o_ref.dtype)

        part = jnp.dot(p_ref[...], w_ref[...], preferred_element_type=jnp.float32)
        if multi_k:
            @pl.when(pl.program_id(1) == 0)
            def _init():
                acc_ref[...] = jnp.zeros_like(acc_ref)
            acc_ref[...] += part

            @pl.when(pl.program_id(1) == pl.num_programs(1) - 1)
            def _fin():
                epilogue(acc_ref[...])
        else:
            epilogue(part)      # single K step: no VMEM accumulator round-trip
    return kernel


def _pick_tm(m):
    for t in (512, 256, 128, 64, 32, 16, 8):
        if m % t == 0 and m // t >= 2:     # keep >=2 grid steps (megacore)
            return t
    for t in (512, 256, 128, 64, 32, 16, 8):
        if m % t == 0:
            return t
    return m


def _pick_tk(k):
    if k <= 2048:
        return k                            # single chunk, full-extent block
    for t in (2048, 1024, 512, 256, 128):
        if k % t == 0:
            return t
    return k


def matmul_bn_act(patches, w, bias, residual=None, *, relu, out_dtype):
    m, k = patches.shape
    cout_p = w.shape[-1]
    tm, tk = _pick_tm(m), _pick_tk(k)
    nk = k // tk
    multi_k = nk > 1
    grid = (m // tm, nk)
    in_specs = [
        pl.BlockSpec((tm, tk), lambda i, kk: (i, kk)),
        pl.BlockSpec((tk, cout_p), lambda i, kk: (kk, 0)),
        pl.BlockSpec((1, cout_p), lambda i, kk: (0, 0)),
    ]
    args = [patches, w, bias]
    res_bytes = 0
    if residual is not None:
        in_specs.append(pl.BlockSpec((tm, cout_p), lambda i, kk: (i, 0)))
        args.append(residual)
        res_bytes = tm * cout_p * 2
    scratch = [pltpu.VMEM((tm, cout_p), jnp.float32)] if multi_k else []
    out_bytes = 2 if out_dtype == jnp.bfloat16 else 4
    flops = 2 * m * k * cout_p
    bytes_accessed = int(patches.size * 2 + w.size * 2 + m * cout_p * out_bytes
                         + (m * cout_p * 2 if residual is not None else 0))
    return pl.pallas_call(
        _make_mm_kernel(relu, residual is not None, multi_k),
        out_shape=jax.ShapeDtypeStruct((m, cout_p), out_dtype),
        grid=grid,
        in_specs=in_specs,
        out_specs=pl.BlockSpec((tm, cout_p), lambda i, kk: (i, 0)),
        scratch_shapes=scratch,
        compiler_params=pltpu.CompilerParams(
            dimension_semantics=("parallel", "arbitrary"),
            vmem_limit_bytes=_vmem_limit(
                tm * tk * 2, tk * cout_p * 2,
                tm * cout_p * (out_bytes + (4 if multi_k else 0)), res_bytes)),
        cost_estimate=pl.CostEstimate(flops=flops, transcendentals=0,
                                      bytes_accessed=bytes_accessed),
    )(*args)


def _strided_patches(x_nhwc, k, stride):
    """im2col (pad=1 for k=3, pad=0 for k=1). Glue only."""
    # TODO(synk): the patch matrix is still materialized by XLA in HBM; an
    #             in-kernel gather (scalar-prefetch index_map) would avoid it.
    pad = 1 if k == 3 else 0
    n, h, w, c = x_nhwc.shape
    xp = jnp.pad(x_nhwc, ((0, 0), (pad, pad), (pad, pad), (0, 0)))
    hp, wp = h + 2 * pad, w + 2 * pad
    ho = (hp - k) // stride + 1
    wo = (wp - k) // stride + 1
    cols = []
    for ky in range(k):
        for kx in range(k):
            cols.append(xp[:, ky:ky + (ho - 1) * stride + 1:stride,
                           kx:kx + (wo - 1) * stride + 1:stride, :])
    patches = jnp.concatenate(cols, axis=-1)
    return patches.reshape(n * ho * wo, k * k * c), (n, ho, wo)


def conv_im2col_bn_act(x_nhwc, w_hwio, scale, bias, stride, *, relu,
                       residual_nhwc=None, out_dtype, keep_cpad=False):
    n, h, w, cin = x_nhwc.shape
    kh, kw, _, cout = w_hwio.shape
    cin_p = _round_up(cin, SUBLANE)
    cout_p = _round_up(cout, LANE)
    xpc = jnp.pad(x_nhwc, ((0, 0), (0, 0), (0, 0), (0, cin_p - cin)))
    patches, (_, ho, wo) = _strided_patches(xpc, kh, stride)
    patches = patches.astype(jnp.bfloat16)
    wf = w_hwio * scale.reshape(1, 1, 1, -1)
    wf = jnp.pad(wf, ((0, 0), (0, 0), (0, cin_p - cin), (0, cout_p - cout)))
    wf = wf.reshape(kh * kw * cin_p, cout_p).astype(jnp.bfloat16)
    bf = jnp.pad(bias, (0, cout_p - cout)).reshape(1, cout_p).astype(jnp.float32)
    res = None
    if residual_nhwc is not None:
        res = jnp.pad(residual_nhwc,
                      ((0, 0), (0, 0), (0, 0),
                       (0, cout_p - residual_nhwc.shape[-1])))
        res = res.reshape(n * ho * wo, cout_p).astype(jnp.bfloat16)
    out = matmul_bn_act(patches, wf, bf, res, relu=relu, out_dtype=out_dtype)
    out = out.reshape(n, ho, wo, cout_p)
    return out if keep_cpad else out[..., :cout]


# ---------------------------------------------------------------------------
# Parameter init, BN folding, block forward, reference
# ---------------------------------------------------------------------------
def _bn_fold(gamma, beta, mean, var):
    scale = gamma / jnp.sqrt(var + EPS)
    return scale, beta - mean * scale


def init_params(key, in_planes, planes, stride):
    ks = jax.random.split(key, 6)

    def bn_params(k):
        k1, k2, k3, k4 = jax.random.split(k, 4)
        gamma = jax.random.uniform(k1, (planes,), minval=0.5, maxval=1.5)
        beta = 0.1 * jax.random.normal(k2, (planes,))
        mean = 0.1 * jax.random.normal(k3, (planes,))
        var = jax.random.uniform(k4, (planes,), minval=0.5, maxval=1.5)
        return gamma, beta, mean, var

    p = {
        "w1": 0.2 * jax.random.normal(ks[0], (3, 3, in_planes, planes), jnp.float32),
        "bn1": bn_params(ks[1]),
        "w2": 0.2 * jax.random.normal(ks[2], (3, 3, planes, planes), jnp.float32),
        "bn2": bn_params(ks[3]),
        "has_sc_conv": (stride != 1) or (in_planes != planes),
    }
    if p["has_sc_conv"]:
        p["wsc"] = 0.2 * jax.random.normal(ks[4], (1, 1, in_planes, planes), jnp.float32)
        p["bnsc"] = bn_params(ks[5])
    return p


def basic_block_forward(x_nchw, params, stride):
    x = jnp.transpose(x_nchw, (0, 2, 3, 1)).astype(jnp.float32)   # NCHW -> NHWC
    n, h, w, cin = x.shape
    planes = params["w1"].shape[-1]
    ho, wo = h // stride, w // stride
    s1, b1 = _bn_fold(*params["bn1"])
    s2, b2 = _bn_fold(*params["bn2"])

    tap1 = (stride == 1) and (cin >= TAP_MIN_CIN)
    tap2 = planes >= TAP_MIN_CIN
    cpl = _round_up(planes, LANE)

    # conv1 + bn1 + relu (bf16 output feeds conv2 directly)
    x_slab = None
    if tap1:
        x_slab = slab_from_nhwc(x, _round_up(cin, LANE))
        out1_slab = conv3x3_s1_slab(x_slab, params["w1"], s1, b1, h, w,
                                    out_dtype=jnp.bfloat16)
        out1_nhwc = None
    else:
        out1_nhwc = conv_im2col_bn_act(x, params["w1"], s1, b1, stride,
                                       relu=True, out_dtype=jnp.bfloat16,
                                       keep_cpad=tap2)
        out1_slab = None

    # shortcut branch residual (bf16)
    if params["has_sc_conv"]:
        ssc, bsc = _bn_fold(*params["bnsc"])
        res_nhwc = conv_im2col_bn_act(x, params["wsc"], ssc, bsc, stride,
                                      relu=False, out_dtype=jnp.bfloat16,
                                      keep_cpad=tap2)
    else:
        res_nhwc = x                       # identity: stride == 1, cin == planes

    # conv2 + bn2 + shortcut add + relu
    if tap2:
        if out1_slab is None:
            out1_slab = slab_from_nhwc(out1_nhwc, cpl)
        if params["has_sc_conv"]:
            res_slab = slab_from_nhwc(res_nhwc, cpl)
        elif x_slab is not None:
            res_slab = x_slab              # identity: reuse conv1's input slab
        else:
            res_slab = slab_from_nhwc(x, cpl)
        out2_slab = conv3x3_s1_slab(out1_slab, params["w2"], s2, b2, ho, wo,
                                    residual_slab=res_slab,
                                    out_dtype=jnp.float32)
        out = nhwc_from_slab(out2_slab, ho, wo, planes)
    else:
        if out1_nhwc is None:
            out1_nhwc = nhwc_from_slab(out1_slab, ho, wo, planes)
        out = conv_im2col_bn_act(out1_nhwc, params["w2"], s2, b2, 1,
                                 relu=True, residual_nhwc=res_nhwc,
                                 out_dtype=jnp.float32)
    return jnp.transpose(out, (0, 3, 1, 2))                       # NHWC -> NCHW


def reference_forward(x_nchw, params, stride):
    """Independent lax.conv reference, precision-matched to the kernel path
    (bf16 MXU operands, f32 accumulation, folded BN, bf16 residual)."""
    x = jnp.transpose(x_nchw, (0, 2, 3, 1)).astype(jnp.float32)

    def conv_bn(y, w_hwio, bn, s, pad):
        scale, bias = _bn_fold(*bn)
        wf = (w_hwio * scale.reshape(1, 1, 1, -1)).astype(jnp.bfloat16)
        out = lax.conv_general_dilated(
            y.astype(jnp.bfloat16), wf, (s, s), [(pad, pad), (pad, pad)],
            dimension_numbers=("NHWC", "HWIO", "NHWC"),
            preferred_element_type=jnp.float32)
        return out + bias.reshape(1, 1, 1, -1)

    out1 = jax.nn.relu(conv_bn(x, params["w1"], params["bn1"], stride, 1))
    out2 = conv_bn(out1, params["w2"], params["bn2"], 1, 1)
    if params["has_sc_conv"]:
        sc = conv_bn(x, params["wsc"], params["bnsc"], stride, 0)
    else:
        sc = x
    sc = sc.astype(jnp.bfloat16).astype(jnp.float32)   # kernel carries bf16 res
    out = jax.nn.relu(out2 + sc)
    return jnp.transpose(out, (0, 3, 1, 2))


if __name__ == "__main__":
    def run_case(key, n, in_planes, planes, h, w, stride):
        kx, kp = jax.random.split(key)
        x = jax.random.normal(kx, (n, in_planes, h, w), dtype=jnp.float32)
        params = init_params(kp, in_planes, planes, stride)
        out = jax.block_until_ready(basic_block_forward(x, params, stride))
        ref = jax.block_until_ready(reference_forward(x, params, stride))
        assert out.shape == (n, planes, h // stride, w // stride), out.shape
        err = float(jnp.max(jnp.abs(out - ref)))
        assert bool(jnp.allclose(out, ref, atol=5e-2, rtol=2e-2)), err

    keys = jax.random.split(jax.random.PRNGKey(0), 4)
    run_case(keys[0], 2, 4, 8, 16, 16, 2)      # strided, 1x1-conv shortcut (im2col path)
    run_case(keys[1], 2, 8, 8, 16, 16, 1)      # stride-1, identity shortcut (im2col path)
    run_case(keys[2], 2, 128, 128, 16, 16, 1)  # stride-1, identity shortcut (tap/slab path)
    run_case(keys[3], 1, 64, 128, 8, 8, 2)     # strided conv1 -> tap conv2 + conv-shortcut
    print("KERNEL_OK")
</pallas_src>

<mosaic_0001>
module attributes {stable_mosaic.version = 11 : i64} {
  func.func @kernel(%arg0: i32, %arg1: i32, %arg2: memref<64x72xbf16, #tpu.memory_space<vmem>>, %arg3: memref<72x128xbf16, #tpu.memory_space<vmem>>, %arg4: memref<1x128xf32, #tpu.memory_space<vmem>>, %arg5: memref<64x128xbf16, #tpu.memory_space<vmem>>) attributes {dimension_semantics = [#tpu.dimension_semantics<parallel>, #tpu.dimension_semantics<arbitrary>], iteration_bounds = array<i64: 2, 1>, scalar_prefetch = 0 : i64, scratch_operands = 0 : i64, tpu.core_type = #tpu.core_type<tc>, window_params = [{transform_indices = @transform_0, window_bounds = array<i64: 64, 72>}, {transform_indices = @transform_1, window_bounds = array<i64: 72, 128>}, {pipeline_mode = #tpu.pipeline_mode<synchronous>, transform_indices = @transform_2, window_bounds = array<i64: 1, 128>}, {transform_indices = @transform_3, window_bounds = array<i64: 64, 128>}]} {
    %c0 = arith.constant 0 : index
    %c0_0 = arith.constant 0 : index
    %0 = vector.load %arg2[%c0, %c0_0] : memref<64x72xbf16, #tpu.memory_space<vmem>>, vector<64x72xbf16>
    %c0_1 = arith.constant 0 : index
    %c0_2 = arith.constant 0 : index
    %1 = vector.load %arg3[%c0_1, %c0_2] : memref<72x128xbf16, #tpu.memory_space<vmem>>, vector<72x128xbf16>
    %cst = arith.constant dense<0.000000e+00> : vector<64x128xf32>
    %2 = tpu.matmul %0, %1, %cst {dimension_numbers = #tpu.dot_dimension_numbers<[1], [0], [0], [1], [0, 0, 1, 1], [], []>} : vector<64x72xbf16>, vector<72x128xbf16>, vector<64x128xf32> -> vector<64x128xf32>
    %c0_3 = arith.constant 0 : index
    %c0_4 = arith.constant 0 : index
    %3 = vector.load %arg4[%c0_3, %c0_4] : memref<1x128xf32, #tpu.memory_space<vmem>>, vector<1x128xf32>
    %4 = vector.broadcast %3 : vector<1x128xf32> to vector<64x128xf32>
    %5 = arith.addf %2, %4 : vector<64x128xf32>
    %cst_5 = arith.constant 0.000000e+00 : f32
    %6 = vector.broadcast %cst_5 : f32 to vector<64x128xf32>
    %7 = arith.maximumf %5, %6 : vector<64x128xf32>
    %8 = arith.truncf %7 : vector<64x128xf32> to vector<64x128xbf16>
    %c0_6 = arith.constant 0 : index
    %c0_7 = arith.constant 0 : index
    %9 = vector.load %arg5[%c0_6, %c0_7] : memref<64x128xbf16, #tpu.memory_space<vmem>>, vector<64x128xbf16>
    tpu.vector_store %arg5[%c0_6, %c0_7], %8 {strides = array<i32>} : memref<64x128xbf16, #tpu.memory_space<vmem>>, vector<64x128xbf16>,
    return
  }
  func.func @transform_0(%arg0: i32, %arg1: i32) -> (i32, i32) {
    %c0_i32 = arith.constant 0 : i32
    return %arg0, %arg1 : i32, i32
  }
  func.func @transform_1(%arg0: i32, %arg1: i32) -> (i32, i32) {
    %c0_i32 = arith.constant 0 : i32
    %c0_i32_0 = arith.constant 0 : i32
    return %arg1, %c0_i32 : i32, i32
  }
  func.func @transform_2(%arg0: i32, %arg1: i32) -> (i32, i32) {
    %c0_i32 = arith.constant 0 : i32
    %c0_i32_0 = arith.constant 0 : i32
    %c0_i32_1 = arith.constant 0 : i32
    return %c0_i32, %c0_i32_0 : i32, i32
  }
  func.func @transform_3(%arg0: i32, %arg1: i32) -> (i32, i32) {
    %c0_i32 = arith.constant 0 : i32
    %c0_i32_0 = arith.constant 0 : i32
    return %arg0, %c0_i32 : i32, i32
  }
}

</mosaic_0001>

<bundles_post_ra>
// kernel: tpu_custom_call.1
= control target key start
LH: loop header
LB: loop body
LE: loop exit
PB: predicated region body
PF: predicated region fallthrough
CT: control target
= control target key end

     0   :  { %8 = vsyncpa [#allocation3], 0  ;;  %s934_s0 = inlined_call_operand.vmem [shape: bf16[128,72], index: 0, kind: input, shape index: {}]   ;;  %s935_s1 = inlined_call_operand.vmem [shape: bf16[72,128], index: 1, kind: input, shape index: {}]   ;;  %s936_s2 = inlined_call_operand.vmem [shape: f32[1,128], index: 2, kind: input, shape index: {}]   ;;  %s937_s3 = inlined_call_operand.hbm [shape: bf16[128,128], index: 3, kind: output, shape index: {}]  }
   0x1   :  { %10 = vsyncpa [#allocation3 + $0x1], 0  ;;  %s795_s12 = smov 0   ;;  %s797_s13 = smov 0  }
   0x2   :  { %s799_s14 = smov 0   ;;  %s801_s15 = smov 0  }
   0x3   :  { %s803_s16 = smov 0   ;;  %s805_s17 = smov 0  }
   0x4 LB: > { %s521_s18 = sadd.s32 4294967295, %s770_s17   ;;  %s522_s19 = sadd.s32 4294967294, %s770_s17   ;;  %s770_s17 = sphi %s805_s17, %s16_s17   ;;  %s766_s16 = sphi %s803_s16, %s944_s16   ;;  %s762_s15 = sphi %s801_s15, %s943_s15   ;;  %s758_s14 = sphi %s799_s14, %s942_s14   ;;  %s754_s13 = sphi %s797_s13, %s941_s13   ;;  %s750_s12 = sphi %s795_s12, %s940_s12  }
   0x5   : > { %s28_s20 = sadd.s32 1, %s766_s16  ;;  %s110_s21 = sadd.s32 1, %s758_s14 }
   0x6   : > { %p30_p0 = scmp.ge.s32.totalorder %s28_s20, 2  ;;  %p120_p1 = scmp.ne.s32.totalorder %s758_s14, %s754_s13 }
   0x7   : > { %p121_p2 = scmp.eq.s32.totalorder %s521_s18, 1  ;;  %p126_p3 = scmp.ne.s32.totalorder %s754_s13, %s750_s12 }
   0x8   : > { %s946_s20 = smov (%p30_p0, %s28_s20), 0  ;;  %p127_p5 = scmp.eq.s32.totalorder %s522_s19, 1 }
   0x9   : > { %p835_p4 = por %p121_p2, %p120_p1  ;;  %s107_s23 = ssub.s32 %s766_s16, %s946_s20 }
   0xa   : > { %p526_p6 = scmp.ge.s32.totalorder %s770_s17, 1  ;;  %p108_p7 = scmp.eq.s32.totalorder %s107_s23, 0 }
   0xb   : > { %p842_p8 = por %p127_p5, %p126_p3  ;;  %p169_p9 = scmp.lt.s32.totalorder %s770_s17, 3 }
   0xc   : > { %s848_s25 = scalar_select %p108_p7, %s758_s14, %s110_s21  }
   0xd   : > { %p170_p10 = pnand %p526_p6, %p169_p9 }
   0xe   : > { %s528_s30 = sshll.u32 (!%p170_p10), %s762_s15, 3  ;;  %s198_s21 = sand.u32 (!%p170_p10), 1, %s754_s13  }
   0xf   : > { %173 = sbr.rel (%p170_p10) target bundleno = 260 (0x104), region = 32  ;;  %p202_p11 = scmp.lt.s32.totalorder (!%p170_p10), %s528_s30, 15 }
  0x10   : > { %s527_s27 = sshll.u32 (!%p170_p10), %s198_s21, 5 }
  0x11   : > { %s200_s28 = scalar_lea.vmem (!%p170_p10), [#allocation2], %s527_s27 }
  0x12   : > { %s433_s29 = sshll.u32 (!%p170_p10), %s200_s28, 4  ;;  %s880_s29 = int_to_ptr.vmem [resolvable:$true] %s433_s29 }
  0x13   : > { %s694_s7 = scalar_lea.vmem (!%p170_p10), %s880_s29, 512 }
  0x14   : > { %v685_v0 = vld [vmem:[%s935_s1 + $0x20] ss:$0 sps:$4 sm:$0xff]   ;;  %vm302_vm0 = vcmask 1043456   ;;  %v686_v1 = vld [vmem:[%s935_s1 + $0x18] sm:$0xff]   ;;  %v687_v3 = vld [vmem:[%s935_s1 + $0x10] sm:$0xff]   ;;  %s948_s30 = smov (!%p202_p11, %s528_s30), 15  ;;  %p695_p12 = scmp.ne.s32.totalorder %s880_s29, %s694_s7 }
  0x15   : > { %626 = vmatprep.subr.msk.bf16.mxu0 %vm302_vm0, %v685_v0  ;;  %627 = vmatprep.subr.msk.bf16.mxu1 %vm302_vm0, %v685_v0  ;;  %v304_v2 = vsel %vm302_vm0, %v685_v0, 0  ;;  %v688_v4 = vld [vmem:[%s935_s1 + $0x8] sm:$0xff]   ;;  %s529_s8 = sshll.u32 %s948_s30, 2  ;;  %vm289_vm1 = vcmask 588800   ;;  %v689_v7 = vld [vmem:[%s935_s1] sm:$0xff]   ;;  %s565_s30 = sshll.u32 %s762_s15, 9 }
  0x16   : > { %599 = vmatpush3.bf16.msra.mxu0 %v304_v2  ;;  %621 = vmatpush3.bf16.msra.mxu1 %v304_v2  ;;  %s208_s11 = scalar_lea.vmem %s934_s0, %s529_s8  ;;  %v530_v10 = vld [vmem:[%s936_s2] ss:$0 sm:$0xff]  ;;  %s885_s6 = scalar_lea.hbm %s937_s3, %s565_s30 }
  0x17   : > { %600 = vmatprep.subr.bf16.mxu0 %v686_v1  ;;  %617 = vmatprep.subr.bf16.mxu1 %v686_v1  ;;  %v690_v5 = vld [vmem:[%s208_s11] sm:$0xff]   ;;  %v691_v6 = vld [vmem:[%s208_s11 + $0x10] sm:$0xff]   ;;  %v692_v8 = vld [vmem:[%s208_s11 + $0x8] sm:$0xff]   ;;  %s889_s15 = scalar_lea.sflag [#allocation3], %s198_s21  ;;  %p696_p13 = pnand %p695_p12, %p835_p4 }
  0x18   : > { %608 = vmatprep.mubr.msk.bf16.mxu0 %vm289_vm1, %v690_v5  ;;  %612 = vmatprep.mubr.msk.bf16.mxu1 %vm289_vm1, %v691_v6  ;;  %v693_v9 = vld [vmem:[%s208_s11 + $0x18] sm:$0xff]   ;;  %s772_s8 = smov [#allocation2]  }
  0x19   : > { %p697_p0 = pneg %p696_p13  ;;  %s698_s9 = sshll.u32 %s772_s8, 4  ;;  %s699_s9 = int_to_ptr.vmem [resolvable:$false] %s698_s9 }
  0x1a   : > { %601 = vmatpush3.bf16.msra.mxu0 %v686_v1  ;;  %622 = vmatpush3.bf16.msra.mxu1 %v686_v1  ;;  %s700_s10 = scalar_lea.vmem %s699_s9, 1024  ;;  %p701_p1 = scmp.lt.s32.totalorder %s880_s29, %s699_s9 }
  0x1b   : > { %602 = vmatprep.subr.bf16.mxu0 %v687_v3  ;;  %618 = vmatprep.subr.bf16.mxu1 %v687_v3  ;;  %p702_p2 = scmp.lt.s32.totalorder %s700_s10, %s694_s7 }
  0x1d   : > { %p703_p3 = por %p702_p2, %p701_p1 }
  0x1e   : > { %603 = vmatpush3.bf16.msra.mxu0 %v687_v3  ;;  %623 = vmatpush3.bf16.msra.mxu1 %v687_v3 }
  0x1f   : > { %604 = vmatprep.subr.bf16.mxu0 %v688_v4  ;;  %619 = vmatprep.subr.bf16.mxu1 %v688_v4  ;;  %p704_p5 = pnand %p703_p3, %p697_p0 }
  0x22   : > { %605 = vmatpush3.bf16.msra.mxu0 %v688_v4  ;;  %624 = vmatpush3.bf16.msra.mxu1 %v688_v4 }
  0x23   : > { %606 = vmatprep.subr.bf16.mxu0 %v689_v7  ;;  %620 = vmatprep.subr.bf16.mxu1 %v689_v7 }
  0x26   : > { %607 = vmatpush3.bf16.msra.mxu0 %v689_v7  ;;  %625 = vmatpush3.bf16.msra.mxu1 %v689_v7 }
  0x29   : > { %609 = vmatmul.mubr.msk.bf16.vlgmr.msra.gmra.mxu0 %vm289_vm1, %v692_v8  ;;  %613 = vmatmul.mubr.msk.bf16.vlgmr.msra.gmra.mxu1 %vm289_vm1, %v693_v9 }
  0xe9   : > { %v610_v11 = vpop.f32.mrf.mxu0  ;;  %v614_v12 = vpop.f32.mrf.mxu1 }
  0xea   : > { %v349_v13 = vadd.f32 %v610_v11, %v530_v10  ;;  %v365_v14 = vadd.f32 %v614_v12, %v530_v10 }
  0xeb   : > { %v340_v15 = vpop.f32.mrf.mxu0  ;;  %v356_v16 = vpop.f32.mrf.mxu1 }
  0xec   : > { %v341_v17 = vadd.f32 %v530_v10, %v340_v15  ;;  %v357_v18 = vadd.f32 %v530_v10, %v356_v16  ;;  %v373_v23 = vmax.f32 %v349_v13, 0.0  ;;  %v377_v24 = vmax.f32 %v365_v14, 0.0 }
  0xed   : > { %v611_v19 = vpop.f32.mrf.mxu0  ;;  %v615_v20 = vpop.f32.mrf.mxu1 }
  0xee   : > { %v352_v21 = vadd.f32 %v611_v19, %v530_v10  ;;  %v368_v22 = vadd.f32 %v615_v20, %v530_v10  ;;  %v371_v31 = vmax.f32 %v341_v17, 0.0  ;;  %v375_v32 = vmax.f32 %v357_v18, 0.0 }
  0xef   : > { %v343_v25 = vpop.f32.mrf.mxu0  ;;  %v359_v26 = vpop.f32.mrf.mxu1 }
  0xf0   : > { %v374_v27 = vmax.f32 %v352_v21, 0.0  ;;  %v378_v28 = vmax.f32 %v368_v22, 0.0  ;;  %v344_v29 = vadd.f32 %v530_v10, %v343_v25  ;;  %v360_v30 = vadd.f32 %v530_v10, %v359_v26 }
  0xf2   : > { %v574_v33 = vpack.c.bf16 %v374_v27, %v373_v23  ;;  %v584_v34 = vpack.c.bf16 %v378_v28, %v377_v24  ;;  %v372_v35 = vmax.f32 %v344_v29, 0.0  ;;  %v376_v36 = vmax.f32 %v360_v30, 0.0 }
  0xf4   : > { %586 = vst [vmem:[%s200_s28 + $0x8] sm:$0xff] %v574_v33   ;;  %588 = vst [vmem:[%s200_s28 + $0x18] sm:$0xff] %v584_v34   ;;  %v569_v37 = vpack.c.bf16 %v372_v35, %v371_v31  ;;  %v579_v38 = vpack.c.bf16 %v376_v36, %v375_v32 }
  0xf6   : > { %570 = vst [vmem:[%s200_s28] sm:$0xff] %v569_v37   ;;  %587 = vst [vmem:[%s200_s28 + $0x10] sm:$0xff] %v579_v38  }
  0xf7   : > { %707 = shalt.err (!%p704_p5)
}
  0xf8   : > { %s708_s11 = scalar_lea.hbm %s885_s6, 512  ;;  %s712_s21 = scalar_lea.hbm %s937_s3, 1024 }
  0xf9   : > { %p709_p6 = scmp.ne.s32.totalorder %s885_s6, %s708_s11  ;;  %p713_p10 = scmp.lt.s32.totalorder %s885_s6, %s937_s3 }
  0xfa   : > { %p714_p11 = scmp.lt.s32.totalorder %s712_s21, %s708_s11 }
  0xfb   : > { %p710_p7 = pnand %p709_p6, %p835_p4 }
  0xfc   : > { %p715_p12 = por %p714_p11, %p713_p10 }
  0xfd   : > { %p711_p9 = pneg %p710_p7 }
  0xff   : > { %p716_p13 = pnand %p715_p12, %p711_p9 }
 0x101   : > { %719 = shalt.err (!%p716_p13)
}
 0x102   : > { %s773_s27 = smov 64   ;;  %s774_s28 = smov 4  }
 0x103   : > { %628 = dma.vmem_to_hbm [thread:$0]  (%p835_p4), %s880_s29, 512, %s885_s6, %s889_s15, %s773_s27, %s773_s27, %s774_s28  }
 0x104 PF: > { %p634_p0 = scmp.ge.s32.totalorder %s770_s17, 2  ;;  %s448_s30 = sand.u32 1, %s750_s12  }
 0x105   : > { %s449_s4 = scalar_lea.sflag [#allocation3], %s448_s30 }
 0x106   : > { %p631_p1 = pnand %p634_p0, %p842_p8 }
 0x108   : > { %p632_p2 = pneg %p631_p1 }
 0x10a   : > { %745 = dma.done.wait (%p632_p2), %s449_s4, 512  }
 0x10b   : > { %747 = vsyncadd (%p632_p2), %s449_s4, 4294966784  ;;  %s16_s17 = sadd.s32 1, %s770_s17   ;;  %s940_s12 = smov %s754_s13 }
 0x10c   : > { %p13_p3 = scmp.ge.s32.totalorder %s16_s17, 4   ;;  %s941_s13 = smov %s758_s14 }
 0x10d   : > { %s942_s14 = smov %s848_s25  ;;  %s943_s15 = smov %s766_s16 }
 0x10e   : > { %s944_s16 = smov %s946_s20  ;;  %15 = sbr.rel (!%p13_p3) target bundleno = 4 (0x4), region = 70 }
 0x113   :  { %454 = vsyncpa [#allocation3], 1 }
 0x114   :  { %456 = vsyncpa [#allocation3 + $0x1], 1 }

</bundles_post_ra>
